<compile_context>
chip_gen: v6e
topology: v6e:2x2x1
jax: 0.10.0
libtpu: 0.0.40
codegen_flags: <defaults>
</compile_context>

<pallas_src>
import jax
import jax.numpy as jnp
from jax import lax
from jax.experimental import pallas as pl
from jax.experimental.pallas import tpu as pltpu

N_FEATURES = 28 * 28   # 784
N_TARGETS = 10


def _linear_kernel(x_ref, w_ref, b_ref, o_ref):
    # x_ref: [TM, 784] bf16   w_ref: [10, 784] bf16 (lane-dense)
    # b_ref: [1, 10]   f32    o_ref: [TM, 10]  f32
    # out = x @ W^T + b, MXU matmul with f32 accumulation.
    acc = lax.dot_general(
        x_ref[...],
        w_ref[...],
        dimension_numbers=(((1,), (1,)), ((), ())),   # contract feature dims
        preferred_element_type=jnp.float32,
    )
    o_ref[...] = (acc + b_ref[...]).astype(o_ref.dtype)


def _round_up(x, m):
    return ((x + m - 1) // m) * m


def mnist_model_forward(xb, weight, bias):
    """Forward pass of MnistModel.

    xb:     [B, 1, 28, 28] float32 (NCHW, like the PyTorch module)
    weight: [10, 784] float32 (torch.nn.Linear layout: out_features x in_features)
    bias:   [10] float32
    returns [B, 10] float32
    """
    B = xb.shape[0]
    x2d = xb.reshape(-1, N_FEATURES).astype(jnp.bfloat16)   # halve x read bytes
    w = weight.astype(jnp.bfloat16)                          # keep [10, 784] lane-dense
    b2d = bias.reshape(1, N_TARGETS).astype(jnp.float32)     # bias add stays fused in-kernel

    # Batch tile: multiple of 8 (sublane), capped at 512 rows so the
    # double-buffered bf16 x block stays tiny in VMEM on every generation
    # (including v7x's 64 MiB). Weight/bias stay resident across grid steps.
    tm = min(512, _round_up(B, 8))
    grid = (pl.cdiv(B, tm),)

    out = pl.pallas_call(
        _linear_kernel,
        out_shape=jax.ShapeDtypeStruct((B, N_TARGETS), jnp.float32),
        grid=grid,
        in_specs=[
            pl.BlockSpec((tm, N_FEATURES), lambda i: (i, 0)),           # x: tiled on batch
            pl.BlockSpec((N_TARGETS, N_FEATURES), lambda i: (0, 0)),    # W: resident
            pl.BlockSpec((1, N_TARGETS), lambda i: (0, 0)),             # b: resident
        ],
        out_specs=pl.BlockSpec((tm, N_TARGETS), lambda i: (i, 0)),
        compiler_params=pltpu.CompilerParams(
            dimension_semantics=("parallel",),   # megacore sharding on v7x
        ),
    )(x2d, w, b2d)
    return out


def init_params(key):
    """Deterministic init mimicking torch.nn.Linear default (U(-1/sqrt(in), 1/sqrt(in)))."""
    kw, kb = jax.random.split(key)
    bound = 1.0 / jnp.sqrt(jnp.float32(N_FEATURES))
    weight = jax.random.uniform(
        kw, (N_TARGETS, N_FEATURES), jnp.float32, minval=-bound, maxval=bound
    )
    bias = jax.random.uniform(
        kb, (N_TARGETS,), jnp.float32, minval=-bound, maxval=bound
    )
    return weight, bias


if __name__ == "__main__":
    key = jax.random.PRNGKey(0)
    k_params, k_x = jax.random.split(key)

    weight, bias = init_params(k_params)

    B = 8
    xb = jax.random.normal(k_x, (B, 1, 28, 28), jnp.float32)

    preds = mnist_model_forward(xb, weight, bias)
    preds = jax.block_until_ready(preds)
    assert preds.shape == (B, N_TARGETS)

    # Tight check vs. a reference that uses the same bf16 input rounding
    # (the kernel multiplies bf16 operands, accumulates in f32).
    x_bf = xb.reshape(-1, N_FEATURES).astype(jnp.bfloat16).astype(jnp.float32)
    w_bf = weight.astype(jnp.bfloat16).astype(jnp.float32)
    ref_bf16 = x_bf @ w_bf.T + bias
    assert jnp.allclose(preds, ref_bf16, atol=1e-3, rtol=1e-3)

    # Loose check vs. the pure-f32 PyTorch-equivalent forward (bf16 input
    # rounding introduces ~0.4% relative error).
    ref_f32 = xb.reshape(-1, N_FEATURES) @ weight.T + bias
    assert jnp.allclose(preds, ref_f32, atol=5e-2, rtol=5e-2)

    print("KERNEL_OK")
</pallas_src>

<mosaic_0001>
module attributes {stable_mosaic.version = 11 : i64} {
  func.func @_linear_kernel(%arg0: i32, %arg1: memref<8x784xbf16, #tpu.memory_space<vmem>>, %arg2: memref<10x784xbf16, #tpu.memory_space<vmem>>, %arg3: memref<1x10xf32, #tpu.memory_space<vmem>>, %arg4: memref<8x10xf32, #tpu.memory_space<vmem>>) attributes {dimension_semantics = [#tpu.dimension_semantics<parallel>], iteration_bounds = array<i64: 1>, scalar_prefetch = 0 : i64, scratch_operands = 0 : i64, tpu.core_type = #tpu.core_type<tc>, window_params = [{transform_indices = @transform_0, window_bounds = array<i64: 8, 784>}, {pipeline_mode = #tpu.pipeline_mode<synchronous>, transform_indices = @transform_1, window_bounds = array<i64: 10, 784>}, {pipeline_mode = #tpu.pipeline_mode<synchronous>, transform_indices = @transform_2, window_bounds = array<i64: 1, 10>}, {transform_indices = @transform_3, window_bounds = array<i64: 8, 10>}]} {
    %c0 = arith.constant 0 : index
    %c0_0 = arith.constant 0 : index
    %0 = vector.load %arg1[%c0, %c0_0] : memref<8x784xbf16, #tpu.memory_space<vmem>>, vector<8x784xbf16>
    %c0_1 = arith.constant 0 : index
    %c0_2 = arith.constant 0 : index
    %1 = vector.load %arg2[%c0_1, %c0_2] : memref<10x784xbf16, #tpu.memory_space<vmem>>, vector<10x784xbf16>
    %cst = arith.constant dense<0.000000e+00> : vector<8x10xf32>
    %2 = tpu.matmul %0, %1, %cst {dimension_numbers = #tpu.dot_dimension_numbers<[1], [1], [0], [0], [0, 0, 1, 0], [], []>} : vector<8x784xbf16>, vector<10x784xbf16>, vector<8x10xf32> -> vector<8x10xf32>
    %c0_3 = arith.constant 0 : index
    %c0_4 = arith.constant 0 : index
    %3 = vector.load %arg3[%c0_3, %c0_4] : memref<1x10xf32, #tpu.memory_space<vmem>>, vector<1x10xf32>
    %4 = vector.broadcast %3 : vector<1x10xf32> to vector<8x10xf32>
    %5 = arith.addf %2, %4 : vector<8x10xf32>
    %c0_5 = arith.constant 0 : index
    %c0_6 = arith.constant 0 : index
    %6 = vector.load %arg4[%c0_5, %c0_6] : memref<8x10xf32, #tpu.memory_space<vmem>>, vector<8x10xf32>
    tpu.vector_store %arg4[%c0_5, %c0_6], %5 {strides = array<i32>} : memref<8x10xf32, #tpu.memory_space<vmem>>, vector<8x10xf32>,
    return
  }
  func.func @transform_0(%arg0: i32) -> (i32, i32) {
    %c0_i32 = arith.constant 0 : i32
    %c0_i32_0 = arith.constant 0 : i32
    return %arg0, %c0_i32 : i32, i32
  }
  func.func @transform_1(%arg0: i32) -> (i32, i32) {
    %c0_i32 = arith.constant 0 : i32
    %c0_i32_0 = arith.constant 0 : i32
    %c0_i32_1 = arith.constant 0 : i32
    return %c0_i32, %c0_i32_0 : i32, i32
  }
  func.func @transform_2(%arg0: i32) -> (i32, i32) {
    %c0_i32 = arith.constant 0 : i32
    %c0_i32_0 = arith.constant 0 : i32
    %c0_i32_1 = arith.constant 0 : i32
    return %c0_i32, %c0_i32_0 : i32, i32
  }
  func.func @transform_3(%arg0: i32) -> (i32, i32) {
    %c0_i32 = arith.constant 0 : i32
    %c0_i32_0 = arith.constant 0 : i32
    return %arg0, %c0_i32 : i32, i32
  }
}

</mosaic_0001>

<bundles_post_ra>
// kernel: tpu_custom_call.1
= control target key start
LH: loop header
LB: loop body
LE: loop exit
PB: predicated region body
PF: predicated region fallthrough
CT: control target
= control target key end

     0   :  { %8 = vsyncpa [#allocation3], 0  ;;  %s460_s0 = inlined_call_operand.hbm [shape: bf16[8,784], index: 0, kind: input, shape index: {}]   ;;  %s461_s1 = inlined_call_operand.hbm [shape: bf16[10,784], index: 1, kind: input, shape index: {}]   ;;  %s462_s2 = inlined_call_operand.vmem [shape: f32[1,10], index: 2, kind: input, shape index: {}]   ;;  %s463_s3 = inlined_call_operand.hbm [shape: f32[8,10], index: 3, kind: output, shape index: {}]  }
   0x1   :  { %9 = vsyncpa [#allocation6], 0 }
   0x2   :  { %10 = vsyncpa [#allocation4], 0  ;;  %s419_s12 = smov [#allocation2]   ;;  %s420_s14 = smov [#allocation5]  }
   0x3   :  { %s17_s13 = sshll.u32 %s419_s12, 4  ;;  %s26_s15 = sshll.u32 %s420_s14, 4  ;;  %s18_s13 = int_to_ptr.vmem [resolvable:$true] %s17_s13  ;;  %s27_s15 = int_to_ptr.vmem [resolvable:$true] %s26_s15 }
   0x4   :  { %s361_s16 = scalar_lea.vmem %s18_s13, 448  ;;  %p366_p1 = scmp.lt.s32.totalorder %s18_s13, %s18_s13 }
   0x5   :  { %p362_p0 = scmp.ne.s32.totalorder %s18_s13, %s361_s16  ;;  %p367_p2 = scmp.lt.s32.totalorder %s361_s16, %s361_s16 }
   0x7   :  { %p368_p3 = por %p367_p2, %p366_p1 }
   0x9   :  { %p369_p4 = pnand %p368_p3, %p362_p0 }
   0xb   :  { %372 = shalt.err (!%p369_p4)
}
   0xc   :  { %20 = dma.hbm_to_vmem [thread:$0]  %s460_s0, 448, %s18_s13, [#allocation3]  }
   0xd   :  { %s381_s19 = scalar_lea.vmem %s27_s15, 896  ;;  %p386_p6 = scmp.lt.s32.totalorder %s27_s15, %s27_s15 }
   0xe   :  { %p382_p5 = scmp.ne.s32.totalorder %s27_s15, %s381_s19  ;;  %p387_p7 = scmp.lt.s32.totalorder %s381_s19, %s381_s19 }
  0x10   :  { %p388_p8 = por %p387_p7, %p386_p6 }
  0x12   :  { %p389_p9 = pnand %p388_p8, %p382_p5 }
  0x14   :  { %392 = shalt.err (!%p389_p9)
}
  0x15   :  { %s421_s20 = smov 448   ;;  %s422_s21 = smov 28  }
  0x16   :  { %32 = dma.hbm_to_vmem [thread:$0]  %s461_s1, 896, %s27_s15, [#allocation6], %s421_s20, %s421_s20, %s422_s21  }
  0x17   :  { %413 = dma.done.wait [#allocation3], 448  }
  0x18   :  { %414 = vsyncadd [#allocation3], 4294966848 }
  0x19   :  { %415 = dma.done.wait [#allocation6], 896  }
  0x1a   :  { %416 = vsyncadd [#allocation6], 4294966400  ;;  %v336_v0 = vld [vmem:[#allocation5 + $0x4] ss:$28 sps:$4 sm:$0x1f]   ;;  %v43_v5 = vld [vmem:[#allocation2 + $0x8] sm:$0xff] }
  0x1b   :  { %v338_v1 = vld [vmem:[#allocation5 + $0xc] ss:$28 sps:$4 sm:$0x1f]   ;;  %141 = vmatprep.subr.bf16.mxu0 %v336_v0  ;;  %v340_v2 = vld [vmem:[#allocation5] ss:$28 sps:$4 sm:$0x1f]   ;;  %v309_v7 = vcombine.high %v43_v5, %v43_v5  ;;  %v308_v13 = vcombine.low %v43_v5, %v43_v5 }
  0x1c   :  { %v341_v3 = vld [vmem:[#allocation5 + $0x8] ss:$28 sps:$4 sm:$0x1f]   ;;  %181 = vmatprep.subr.bf16.mxu1 %v338_v1  ;;  %142 = vmatpush1.bf16.xpose.msra.mxu0 %v340_v2  ;;  %v348_v8 = vld [vmem:[#allocation5 + $0x14] ss:$28 sps:$4 sm:$0x1f]  }
  0x1d   :  { %v42_v4 = vld [vmem:[#allocation2] sm:$0xff]  ;;  %182 = vmatpush1.bf16.xpose.msra.mxu1 %v341_v3  ;;  %v423_v9 = vmov 0.0   ;;  %vm120_vm0 = vcmask 130048   ;;  %v349_v10 = vld [vmem:[#allocation5 + $0x18] ss:$28 sps:$4 sm:$0x1f]   ;;  %199 = vmatprep.mubr.bf16.mxu1 %v309_v7 }
  0x1e   :  { %v307_v6 = vcombine.high %v42_v4, %v42_v4  ;;  %323 = vmatprep.subr.bf16.mxu1 %v423_v9  ;;  %v44_v11 = vld [vmem:[#allocation2 + $0x10] sm:$0xff]  ;;  %v306_v12 = vcombine.low %v42_v4, %v42_v4  ;;  %221 = vmatprep.subr.bf16.mxu0 %v348_v8  ;;  %v346_v14 = vld [vmem:[#allocation5 + $0x10] ss:$28 sps:$4 sm:$0x1f]   ;;  %v125_v15 = vsel %vm120_vm0, %v349_v10, 0  ;;  %vm424_vm1 = vmmov 0  }
  0x1f   :  { %v311_v16 = vcombine.high %v44_v11, %v44_v11  ;;  %v310_v17 = vcombine.low %v44_v11, %v44_v11  ;;  %v352_v18 = vld [vmem:[#allocation2 + $0x18] ss:$0 sps:$4 sm:$0xff]   ;;  %v305_v19 = vld [vmem:[%s462_s2] ss:$0 sm:$0xff]  ;;  %s425_s24 = smov [#allocation7]   ;;  %vm287_vm2 = vcmask 80896  }
  0x20   :  { %159 = vmatprep.mubr.bf16.mxu0 %v307_v6  ;;  %s295_s25 = sshll.u32 %s425_s24, 4  ;;  %s296_s25 = int_to_ptr.vmem [resolvable:$true] %s295_s25 }
  0x21   :  { %s393_s2 = scalar_lea.vmem %s296_s25, 128  ;;  %p398_p11 = scmp.lt.s32.totalorder %s296_s25, %s296_s25 }
  0x22   :  { %p394_p10 = scmp.ne.s32.totalorder %s296_s25, %s393_s2  ;;  %p399_p12 = scmp.lt.s32.totalorder %s393_s2, %s393_s2 }
  0x23   :  { %160 = vmatmul.mubr.bf16.vlgmr.msra.gmra.mxu0 %v306_v12 }
  0x24   :  { %200 = vmatmul.mubr.bf16.vlgmr.msra.gmra.mxu1 %v308_v13  ;;  %222 = vmatpush1.bf16.xpose.msra.mxu0 %v346_v14  ;;  %p400_p13 = por %p399_p12, %p398_p11 }
  0x25   :  { %324 = vmatpush3.bf16.xpose.msra.mxu1 %v125_v15  ;;  %239 = vmatprep.mubr.bf16.mxu0 %v311_v16 }
  0x26   :  { %325 = vmatprep.mubr.msk.bf16.mxu1 %vm424_vm1, %v423_v9  ;;  %p401_p0 = pnand %p400_p13, %p394_p10 }
  0x2b   :  { %240 = vmatmul.mubr.bf16.vlgmr.msra.gmra.mxu0 %v310_v17 }
  0x2c   :  { %326 = vmatmul.mubr.msk.bf16.vlgmr.msra.gmra.mxu1 %vm120_vm0, %v352_v18 }
  0xe3   :  { %v161_v20 = vpop.f32.mrf.mxu0 }
  0xe4   :  { %v201_v21 = vpop.f32.mrf.mxu1  ;;  %v162_v24 = vadd.f32 %v305_v19, %v161_v20 }
  0xe5   :  { %v163_v22 = vpop.f32.mrf.mxu0 }
  0xe6   :  { %v203_v23 = vpop.f32.mrf.mxu1  ;;  %v202_v29 = vadd.f32 %v201_v21, %v162_v24 }
  0xe7   :  { %v164_v25 = vpop.f32.mrf.mxu0 }
  0xe8   :  { %v204_v26 = vpop.f32.mrf.mxu1 }
  0xe9   :  { %v165_v27 = vpop.f32.mrf.mxu0 }
  0xea   :  { %v205_v28 = vpop.f32.mrf.mxu1 }
  0xeb   :  { %v241_v30 = vpop.f32.mrf.mxu0 }
  0xec   :  { %v281_v31 = vpop.f32.mrf.mxu1  ;;  %v242_v32 = vadd.f32 %v241_v30, %v202_v29 }
  0xed   :  { %v243_v33 = vpop.f32.mrf.mxu0 }
  0xee   :  { %v327_v34 = vpop.f32.mrf.mxu1  ;;  %v282_v35 = vadd.f32 %v281_v31, %v242_v32 }
  0xef   :  { %v244_v36 = vpop.f32.mrf.mxu0 }
  0xf0   :  { %v284_v37 = vpop.f32.mrf.mxu1  ;;  %288 = vst.msk [vmem:[#allocation7] sm:$0xff] %vm287_vm2, %v282_v35 }
  0xf1   :  { %v245_v38 = vpop.f32.mrf.mxu0 }
  0xf2   :  { %v328_v39 = vpop.f32.mrf.mxu1 }
  0xf3   :  { %404 = shalt.err (!%p401_p0)
}
  0xf4   :  { %298 = dma.vmem_to_hbm [thread:$0]  %s296_s25, 128, %s463_s3, [#allocation4]  }
  0xf5   :  { %417 = dma.done.wait [#allocation4], 128  }
  0xf6   :  { %418 = vsyncadd [#allocation4], 4294967168 }
  0xf7   :  { %302 = vsyncpa [#allocation3], 1 }
  0xf8   :  { %303 = vsyncpa [#allocation6], 1 }
  0xf9   :  { %304 = vsyncpa [#allocation4], 1 }

</bundles_post_ra>
